<compile_context>
chip_gen: v5e
topology: v5e:2x2
jax: 0.10.0
libtpu: 0.0.40
codegen_flags: <defaults>
</compile_context>

<pallas_src>
import functools

import jax
import jax.numpy as jnp
from jax import lax
from jax.experimental import pallas as pl
from jax.experimental.pallas import tpu as pltpu

MASK_VALUE = float(jnp.finfo(jnp.float32).min)  # finite min (HF GPT-2 style)


# ---------------------------- in-kernel math helpers ----------------------------

def _layernorm(x, g, b, eps):
    mu = jnp.mean(x, axis=-1, keepdims=True)
    var = jnp.mean(jnp.square(x - mu), axis=-1, keepdims=True)
    return (x - mu) * lax.rsqrt(var + eps) * g + b


def _gelu_tanh(x):
    # GPT-2 "gelu_new" (tanh approximation), used inside the GPT-2 MLP.
    return 0.5 * x * (1.0 + jnp.tanh(
        0.7978845608028654 * (x + 0.044715 * x * x * x)))


def _erf_approx(x):
    # Abramowitz & Stegun 7.1.26, |err| <= 1.5e-7 (~f32 eps): exact-GELU semantics
    # without relying on an erf lowering in Mosaic.
    a1, a2, a3, a4, a5 = (0.254829592, -0.284496736, 1.421413741,
                          -1.453152027, 1.061405429)
    p = 0.3275911
    ax = jnp.abs(x)
    t = 1.0 / (1.0 + p * ax)
    poly = ((((a5 * t + a4) * t + a3) * t + a2) * t + a1) * t
    e = 1.0 - poly * jnp.exp(-ax * ax)
    return jnp.where(x >= 0.0, e, -e)


def _gelu_exact(x):
    # F.gelu default (erf-based) used by the Projection head.
    return 0.5 * x * (1.0 + _erf_approx(x * 0.7071067811865476))


# ---------------------------- fused GPT-2 layer (attn + MLP) ----------------------------

def _layer_kernel(h_ref, mask_ref, g1_ref, b1_ref, wqkv_ref, bqkv_ref,
                  wproj_ref, bproj_ref, g2_ref, b2_ref, wfc_ref, bfc_ref,
                  wfcp_ref, bfcp_ref, o_ref, *, n_head, scale, eps):
    h = h_ref[...]                                   # (T, H) f32 residual input
    t, hidden = h.shape
    hd = hidden // n_head

    # ---------------- attention sub-block ----------------
    x = _layernorm(h, g1_ref[...], b1_ref[...], eps)
    qkv = jnp.dot(x.astype(jnp.bfloat16), wqkv_ref[...],
                  preferred_element_type=jnp.float32) + bqkv_ref[...]  # (T, 3H)

    # Single combined causal + key-padding mask (avoids -inf overflow / NaN).
    row = lax.broadcasted_iota(jnp.int32, (t, t), 0)
    col = lax.broadcasted_iota(jnp.int32, (t, t), 1)
    allowed = (col <= row) & (mask_ref[...] > 0.5)   # (T, T)

    heads = []
    for j in range(n_head):                          # all heads in one grid step
        qj = qkv[:, j * hd:(j + 1) * hd].astype(jnp.bfloat16)
        kj = qkv[:, hidden + j * hd:hidden + (j + 1) * hd].astype(jnp.bfloat16)
        vj = qkv[:, 2 * hidden + j * hd:2 * hidden + (j + 1) * hd].astype(jnp.bfloat16)
        # Q @ K^T without materializing a transpose: contract on head_dim.
        s = lax.dot_general(qj, kj, (((1,), (1,)), ((), ())),
                            preferred_element_type=jnp.float32) * scale
        s = jnp.where(allowed, s, MASK_VALUE)
        m = jnp.max(s, axis=-1, keepdims=True)
        e = jnp.exp(s - m)
        denom = jnp.sum(e, axis=-1, keepdims=True)
        p = e * pl.reciprocal(denom, approx=True)    # EUP reciprocal
        heads.append(jnp.dot(p.astype(jnp.bfloat16), vj,
                             preferred_element_type=jnp.float32))
    a = jnp.concatenate(heads, axis=-1)              # (T, H), merge_heads layout

    a = jnp.dot(a.astype(jnp.bfloat16), wproj_ref[...],
                preferred_element_type=jnp.float32) + bproj_ref[...]
    h = h + a                                        # residual (attn dropout = id)

    # ---------------- MLP sub-block ----------------
    x2 = _layernorm(h, g2_ref[...], b2_ref[...], eps)
    u = jnp.dot(x2.astype(jnp.bfloat16), wfc_ref[...],
                preferred_element_type=jnp.float32) + bfc_ref[...]
    u = _gelu_tanh(u)
    mo = jnp.dot(u.astype(jnp.bfloat16), wfcp_ref[...],
                 preferred_element_type=jnp.float32) + bfcp_ref[...]
    o_ref[...] = h + mo                              # residual (mlp dropout = id)


def gpt2_layer(h, mask_b1t, blk, *, n_head, eps=1e-5):
    b, t, hidden = h.shape
    inter = blk['fc_w'].shape[1]
    hd = hidden // n_head
    scale = 1.0 / (hd ** 0.5)
    const2d = lambda i: (0, 0)
    return pl.pallas_call(
        functools.partial(_layer_kernel, n_head=n_head, scale=scale, eps=eps),
        out_shape=jax.ShapeDtypeStruct((b, t, hidden), jnp.float32),
        grid=(b,),
        in_specs=[
            pl.BlockSpec((None, t, hidden), lambda i: (i, 0, 0)),   # residual h
            pl.BlockSpec((None, 1, t), lambda i: (i, 0, 0)),        # padding mask
            pl.BlockSpec((1, hidden), const2d),                     # ln1 gamma
            pl.BlockSpec((1, hidden), const2d),                     # ln1 beta
            pl.BlockSpec((hidden, 3 * hidden), const2d),            # c_attn W (bf16)
            pl.BlockSpec((1, 3 * hidden), const2d),                 # c_attn b
            pl.BlockSpec((hidden, hidden), const2d),                # c_proj W (bf16)
            pl.BlockSpec((1, hidden), const2d),                     # c_proj b
            pl.BlockSpec((1, hidden), const2d),                     # ln2 gamma
            pl.BlockSpec((1, hidden), const2d),                     # ln2 beta
            pl.BlockSpec((hidden, inter), const2d),                 # fc W (bf16)
            pl.BlockSpec((1, inter), const2d),                      # fc b
            pl.BlockSpec((inter, hidden), const2d),                 # mlp proj W (bf16)
            pl.BlockSpec((1, hidden), const2d),                     # mlp proj b
        ],
        out_specs=pl.BlockSpec((None, t, hidden), lambda i: (i, 0, 0)),
        compiler_params=pltpu.CompilerParams(dimension_semantics=("parallel",)),
    )(h, mask_b1t,
      blk['ln1_g'].reshape(1, hidden), blk['ln1_b'].reshape(1, hidden),
      blk['c_attn_w'], blk['c_attn_b'].reshape(1, 3 * hidden),
      blk['c_proj_w'], blk['c_proj_b'].reshape(1, hidden),
      blk['ln2_g'].reshape(1, hidden), blk['ln2_b'].reshape(1, hidden),
      blk['fc_w'], blk['fc_b'].reshape(1, inter),
      blk['fcproj_w'], blk['fcproj_b'].reshape(1, hidden))


# ---------------------------- fused head (LN_f + Projection + L2 norm) ----------------------------

def _head_kernel(x_ref, gf_ref, bf_ref, w1_ref, w2_ref, gp_ref, bp_ref, o_ref, *, eps):
    x = _layernorm(x_ref[...], gf_ref[...], bf_ref[...], eps)      # ln_f on last token
    e1 = jnp.dot(x.astype(jnp.bfloat16), w1_ref[...],
                 preferred_element_type=jnp.float32)               # linear1 (no bias)
    g = _gelu_exact(e1)                                            # F.gelu (erf)
    e2 = jnp.dot(g.astype(jnp.bfloat16), w2_ref[...],
                 preferred_element_type=jnp.float32)               # linear2 (drop = id)
    s = e1 + e2
    ln = _layernorm(s, gp_ref[...], bp_ref[...], eps)
    nrm2 = jnp.sum(ln * ln, axis=-1, keepdims=True)
    o_ref[...] = ln * lax.rsqrt(nrm2)                              # / torch.norm(dim=-1)


def head(last, params, *, eps=1e-5):
    b, hidden = last.shape
    d_out = params['proj_w1'].shape[1]
    return pl.pallas_call(
        functools.partial(_head_kernel, eps=eps),
        out_shape=jax.ShapeDtypeStruct((b, d_out), jnp.float32),
    )(last,
      params['lnf_g'].reshape(1, hidden), params['lnf_b'].reshape(1, hidden),
      params['proj_w1'], params['proj_w2'],
      params['proj_ln_g'].reshape(1, d_out), params['proj_ln_b'].reshape(1, d_out))


# ---------------------------- parameters ----------------------------

def init_params(key, *, vocab, n_pos, hidden, n_layer, d_out):
    keys = iter(jax.random.split(key, 64))

    def nrm(shape, std=0.02, dtype=jnp.float32):
        return (std * jax.random.normal(next(keys), shape)).astype(dtype)

    bf = jnp.bfloat16  # matmul weights stored bf16; LN params / biases stay f32
    params = dict(
        wte=nrm((vocab, hidden)),
        wpe=nrm((n_pos, hidden)),
        lnf_g=jnp.ones((hidden,), jnp.float32),
        lnf_b=jnp.zeros((hidden,), jnp.float32),
        proj_w1=nrm((hidden, d_out), dtype=bf),     # nn.Linear pre-transposed [in, out]
        proj_w2=nrm((d_out, d_out), dtype=bf),
        proj_ln_g=jnp.ones((d_out,), jnp.float32),
        proj_ln_b=jnp.zeros((d_out,), jnp.float32),
        blocks=[],
    )
    for _ in range(n_layer):
        params['blocks'].append(dict(
            ln1_g=jnp.ones((hidden,), jnp.float32),
            ln1_b=jnp.zeros((hidden,), jnp.float32),
            c_attn_w=nrm((hidden, 3 * hidden), dtype=bf),   # GPT-2 Conv1D: [in, out]
            c_attn_b=jnp.zeros((3 * hidden,), jnp.float32),
            c_proj_w=nrm((hidden, hidden), dtype=bf),
            c_proj_b=jnp.zeros((hidden,), jnp.float32),
            ln2_g=jnp.ones((hidden,), jnp.float32),
            ln2_b=jnp.zeros((hidden,), jnp.float32),
            fc_w=nrm((hidden, 4 * hidden), dtype=bf),
            fc_b=jnp.zeros((4 * hidden,), jnp.float32),
            fcproj_w=nrm((4 * hidden, hidden), dtype=bf),
            fcproj_b=jnp.zeros((hidden,), jnp.float32),
        ))
    return params


# ---------------------------- forward ----------------------------

def text_encoder_gpt2_forward(params, input_ids, attention_mask, *, n_head):
    b, t = input_ids.shape
    hidden = params['wte'].shape[1]

    # Embeddings (token + position); embedding dropout = identity (eval).
    h = (params['wte'][input_ids]
         + params['wpe'][jnp.arange(t)][None, :, :]).astype(jnp.float32)

    mask_b1t = attention_mask.astype(jnp.float32).reshape(b, 1, t)

    for blk in params['blocks']:
        # One fused kernel per transformer layer:
        #   h + attn(LN1(h)), then + mlp(LN2(.)), computed without leaving VMEM.
        h = gpt2_layer(h, mask_b1t, blk, n_head=n_head)

    # Only the last token feeds the projection head -> slice before LN_f.
    last = h[:, -1, :]
    return head(last, params)                                  # (B, d_out), L2-normalized


# ---------------------------- main ----------------------------

if __name__ == "__main__":
    VOCAB, N_POS, HIDDEN, N_HEAD, N_LAYER, D_OUT = 64, 16, 32, 2, 2, 16
    B, T = 2, 8

    key = jax.random.PRNGKey(0)
    pkey, ikey = jax.random.split(key)
    params = init_params(pkey, vocab=VOCAB, n_pos=N_POS, hidden=HIDDEN,
                         n_layer=N_LAYER, d_out=D_OUT)

    input_ids = jax.random.randint(ikey, (B, T), 0, VOCAB, dtype=jnp.int32)
    attention_mask = jnp.array([[1] * T, [0, 0] + [1] * (T - 2)], dtype=jnp.int32)

    fwd = jax.jit(functools.partial(text_encoder_gpt2_forward, n_head=N_HEAD))
    out = jax.block_until_ready(fwd(params, input_ids, attention_mask))

    assert out.shape == (B, D_OUT)
    assert bool(jnp.all(jnp.isfinite(out)))
    # outputs are L2-normalized vectors
    assert bool(jnp.allclose(jnp.linalg.norm(out, axis=-1), 1.0, atol=1e-3))
    print("KERNEL_OK")
</pallas_src>

<mosaic_0001>
module attributes {stable_mosaic.version = 11 : i64} {
  func.func @_layer_kernel(%arg0: i32, %arg1: memref<1x8x32xf32, #tpu.memory_space<vmem>>, %arg2: memref<1x1x8xf32, #tpu.memory_space<vmem>>, %arg3: memref<1x32xf32, #tpu.memory_space<vmem>>, %arg4: memref<1x32xf32, #tpu.memory_space<vmem>>, %arg5: memref<32x96xbf16, #tpu.memory_space<vmem>>, %arg6: memref<1x96xf32, #tpu.memory_space<vmem>>, %arg7: memref<32x32xbf16, #tpu.memory_space<vmem>>, %arg8: memref<1x32xf32, #tpu.memory_space<vmem>>, %arg9: memref<1x32xf32, #tpu.memory_space<vmem>>, %arg10: memref<1x32xf32, #tpu.memory_space<vmem>>, %arg11: memref<32x128xbf16, #tpu.memory_space<vmem>>, %arg12: memref<1x128xf32, #tpu.memory_space<vmem>>, %arg13: memref<128x32xbf16, #tpu.memory_space<vmem>>, %arg14: memref<1x32xf32, #tpu.memory_space<vmem>>, %arg15: memref<1x8x32xf32, #tpu.memory_space<vmem>>) attributes {dimension_semantics = [#tpu.dimension_semantics<parallel>], iteration_bounds = array<i64: 2>, scalar_prefetch = 0 : i64, scratch_operands = 0 : i64, tpu.core_type = #tpu.core_type<tc>, window_params = [{transform_indices = @transform_0, window_bounds = array<i64: 1, 8, 32>}, {transform_indices = @transform_1, window_bounds = array<i64: 1, 1, 8>}, {pipeline_mode = #tpu.pipeline_mode<synchronous>, transform_indices = @transform_2, window_bounds = array<i64: 1, 32>}, {pipeline_mode = #tpu.pipeline_mode<synchronous>, transform_indices = @transform_3, window_bounds = array<i64: 1, 32>}, {pipeline_mode = #tpu.pipeline_mode<synchronous>, transform_indices = @transform_4, window_bounds = array<i64: 32, 96>}, {pipeline_mode = #tpu.pipeline_mode<synchronous>, transform_indices = @transform_5, window_bounds = array<i64: 1, 96>}, {pipeline_mode = #tpu.pipeline_mode<synchronous>, transform_indices = @transform_6, window_bounds = array<i64: 32, 32>}, {pipeline_mode = #tpu.pipeline_mode<synchronous>, transform_indices = @transform_7, window_bounds = array<i64: 1, 32>}, {pipeline_mode = #tpu.pipeline_mode<synchronous>, transform_indices = @transform_8, window_bounds = array<i64: 1, 32>}, {pipeline_mode = #tpu.pipeline_mode<synchronous>, transform_indices = @transform_9, window_bounds = array<i64: 1, 32>}, {pipeline_mode = #tpu.pipeline_mode<synchronous>, transform_indices = @transform_10, window_bounds = array<i64: 32, 128>}, {pipeline_mode = #tpu.pipeline_mode<synchronous>, transform_indices = @transform_11, window_bounds = array<i64: 1, 128>}, {pipeline_mode = #tpu.pipeline_mode<synchronous>, transform_indices = @transform_12, window_bounds = array<i64: 128, 32>}, {pipeline_mode = #tpu.pipeline_mode<synchronous>, transform_indices = @transform_13, window_bounds = array<i64: 1, 32>}, {transform_indices = @transform_14, window_bounds = array<i64: 1, 8, 32>}]} {
    %c0 = arith.constant 0 : index
    %c0_0 = arith.constant 0 : index
    %c0_1 = arith.constant 0 : index
    %0 = vector.load %arg1[%c0, %c0_0, %c0_1] : memref<1x8x32xf32, #tpu.memory_space<vmem>>, vector<1x8x32xf32>
    %1 = vector.shape_cast %0 : vector<1x8x32xf32> to vector<8x32xf32>
    %c0_2 = arith.constant 0 : index
    %c0_3 = arith.constant 0 : index
    %2 = vector.load %arg3[%c0_2, %c0_3] : memref<1x32xf32, #tpu.memory_space<vmem>>, vector<1x32xf32>
    %c0_4 = arith.constant 0 : index
    %c0_5 = arith.constant 0 : index
    %3 = vector.load %arg4[%c0_4, %c0_5] : memref<1x32xf32, #tpu.memory_space<vmem>>, vector<1x32xf32>
    %cst = arith.constant dense<0.000000e+00> : vector<8xf32>
    %4 = vector.multi_reduction <add>, %1, %cst [1] : vector<8x32xf32> to vector<8xf32>
    %5 = vector.shape_cast %4 : vector<8xf32> to vector<8x1xf32>
    %cst_6 = arith.constant 3.200000e+01 : f32
    %6 = vector.broadcast %cst_6 : f32 to vector<8x1xf32>
    %7 = arith.divf %5, %6 : vector<8x1xf32>
    %8 = vector.broadcast %7 : vector<8x1xf32> to vector<8x32xf32>
    %9 = arith.subf %1, %8 : vector<8x32xf32>
    %10 = arith.mulf %9, %9 : vector<8x32xf32>
    %cst_7 = arith.constant dense<0.000000e+00> : vector<8xf32>
    %11 = vector.multi_reduction <add>, %10, %cst_7 [1] : vector<8x32xf32> to vector<8xf32>
    %12 = vector.shape_cast %11 : vector<8xf32> to vector<8x1xf32>
    %cst_8 = arith.constant 3.200000e+01 : f32
    %13 = vector.broadcast %cst_8 : f32 to vector<8x1xf32>
    %14 = arith.divf %12, %13 : vector<8x1xf32>
    %15 = vector.broadcast %7 : vector<8x1xf32> to vector<8x32xf32>
    %16 = arith.subf %1, %15 : vector<8x32xf32>
    %cst_9 = arith.constant 9.99999974E-6 : f32
    %17 = vector.broadcast %cst_9 : f32 to vector<8x1xf32>
    %18 = arith.addf %14, %17 : vector<8x1xf32>
    %19 = math.rsqrt %18 : vector<8x1xf32>
    %20 = vector.broadcast %19 : vector<8x1xf32> to vector<8x32xf32>
    %21 = arith.mulf %16, %20 : vector<8x32xf32>
    %22 = vector.broadcast %2 : vector<1x32xf32> to vector<8x32xf32>
    %23 = arith.mulf %21, %22 : vector<8x32xf32>
    %24 = vector.broadcast %3 : vector<1x32xf32> to vector<8x32xf32>
    %25 = arith.addf %23, %24 : vector<8x32xf32>
    %26 = arith.truncf %25 : vector<8x32xf32> to vector<8x32xbf16>
    %c0_10 = arith.constant 0 : index
    %c0_11 = arith.constant 0 : index
    %27 = vector.load %arg5[%c0_10, %c0_11] : memref<32x96xbf16, #tpu.memory_space<vmem>>, vector<32x96xbf16>
    %cst_12 = arith.constant dense<0.000000e+00> : vector<8x96xf32>
    %28 = tpu.matmul %26, %27, %cst_12 {dimension_numbers = #tpu.dot_dimension_numbers<[1], [0], [0], [1], [0, 0, 1, 1], [], []>} : vector<8x32xbf16>, vector<32x96xbf16>, vector<8x96xf32> -> vector<8x96xf32>
    %c0_13 = arith.constant 0 : index
    %c0_14 = arith.constant 0 : index
    %29 = vector.load %arg6[%c0_13, %c0_14] : memref<1x96xf32, #tpu.memory_space<vmem>>, vector<1x96xf32>
    %30 = vector.broadcast %29 : vector<1x96xf32> to vector<8x96xf32>
    %31 = arith.addf %28, %30 : vector<8x96xf32>
    %32 = tpu.iota {dimensions = array<i32: 0>} : vector<8x8xi32>
    %33 = tpu.iota {dimensions = array<i32: 1>} : vector<8x8xi32>
    %34 = arith.cmpi sle, %33, %32 : vector<8x8xi32>
    %c0_15 = arith.constant 0 : index
    %c0_16 = arith.constant 0 : index
    %c0_17 = arith.constant 0 : index
    %35 = vector.load %arg2[%c0_15, %c0_16, %c0_17] : memref<1x1x8xf32, #tpu.memory_space<vmem>>, vector<1x1x8xf32>
    %36 = vector.shape_cast %35 : vector<1x1x8xf32> to vector<1x8xf32>
    %cst_18 = arith.constant 5.000000e-01 : f32
    %37 = vector.broadcast %cst_18 : f32 to vector<1x8xf32>
    %38 = arith.cmpf ogt, %36, %37 : vector<1x8xf32>
    %39 = vector.broadcast %38 : vector<1x8xi1> to vector<8x8xi1>
    %40 = arith.andi %34, %39 : vector<8x8xi1>
    %41 = vector.extract_strided_slice %31 {offsets = [0, 0], sizes = [8, 16], strides = [1, 1]} : vector<8x96xf32> to vector<8x16xf32>
    %42 = arith.truncf %41 : vector<8x16xf32> to vector<8x16xbf16>
    %43 = vector.extract_strided_slice %31 {offsets = [0, 32], sizes = [8, 16], strides = [1, 1]} : vector<8x96xf32> to vector<8x16xf32>
    %44 = arith.truncf %43 : vector<8x16xf32> to vector<8x16xbf16>
    %45 = vector.extract_strided_slice %31 {offsets = [0, 64], sizes = [8, 16], strides = [1, 1]} : vector<8x96xf32> to vector<8x16xf32>
    %46 = arith.truncf %45 : vector<8x16xf32> to vector<8x16xbf16>
    %cst_19 = arith.constant dense<0.000000e+00> : vector<8x8xf32>
    %47 = tpu.matmul %42, %44, %cst_19 {dimension_numbers = #tpu.dot_dimension_numbers<[1], [1], [0], [0], [0, 0, 1, 0], [], []>} : vector<8x16xbf16>, vector<8x16xbf16>, vector<8x8xf32> -> vector<8x8xf32>
    %cst_20 = arith.constant 2.500000e-01 : f32
    %48 = vector.broadcast %cst_20 : f32 to vector<8x8xf32>
    %49 = arith.mulf %47, %48 : vector<8x8xf32>
    %cst_21 = arith.constant -3.40282347E+38 : f32
    %50 = vector.broadcast %cst_21 : f32 to vector<8x8xf32>
    %51 = arith.select %40, %49, %50 : vector<8x8xi1>, vector<8x8xf32>
    %cst_22 = arith.constant dense<0xFF800000> : vector<8xf32>
    %52 = vector.multi_reduction <maximumf>, %51, %cst_22 [1] : vector<8x8xf32> to vector<8xf32>
    %53 = vector.shape_cast %52 : vector<8xf32> to vector<8x1xf32>
    %54 = vector.broadcast %53 : vector<8x1xf32> to vector<8x8xf32>
    %55 = arith.subf %51, %54 : vector<8x8xf32>
    %56 = math.exp %55 : vector<8x8xf32>
    %cst_23 = arith.constant dense<0.000000e+00> : vector<8xf32>
    %57 = vector.multi_reduction <add>, %56, %cst_23 [1] : vector<8x8xf32> to vector<8xf32>
    %58 = vector.shape_cast %57 : vector<8xf32> to vector<8x1xf32>
    %59 = tpu.reciprocal %58 {approx = true} : vector<8x1xf32> -> vector<8x1xf32>
    %60 = vector.broadcast %59 : vector<8x1xf32> to vector<8x8xf32>
    %61 = arith.mulf %56, %60 : vector<8x8xf32>
    %62 = arith.truncf %61 : vector<8x8xf32> to vector<8x8xbf16>
    %cst_24 = arith.constant dense<0.000000e+00> : vector<8x16xf32>
    %63 = tpu.matmul %62, %46, %cst_24 {dimension_numbers = #tpu.dot_dimension_numbers<[1], [0], [0], [1], [0, 0, 1, 1], [], []>} : vector<8x8xbf16>, vector<8x16xbf16>, vector<8x16xf32> -> vector<8x16xf32>
    %64 = vector.extract_strided_slice %31 {offsets = [0, 16], sizes = [8, 16], strides = [1, 1]} : vector<8x96xf32> to vector<8x16xf32>
    %65 = arith.truncf %64 : vector<8x16xf32> to vector<8x16xbf16>
    %66 = vector.extract_strided_slice %31 {offsets = [0, 48], sizes = [8, 16], strides = [1, 1]} : vector<8x96xf32> to vector<8x16xf32>
    %67 = arith.truncf %66 : vector<8x16xf32> to vector<8x16xbf16>
    %68 = vector.extract_strided_slice %31 {offsets = [0, 80], sizes = [8, 16], strides = [1, 1]} : vector<8x96xf32> to vector<8x16xf32>
    %69 = arith.truncf %68 : vector<8x16xf32> to vector<8x16xbf16>
    %cst_25 = arith.constant dense<0.000000e+00> : vector<8x8xf32>
    %70 = tpu.matmul %65, %67, %cst_25 {dimension_numbers = #tpu.dot_dimension_numbers<[1], [1], [0], [0], [0, 0, 1, 0], [], []>} : vector<8x16xbf16>, vector<8x16xbf16>, vector<8x8xf32> -> vector<8x8xf32>
    %cst_26 = arith.constant 2.500000e-01 : f32
    %71 = vector.broadcast %cst_26 : f32 to vector<8x8xf32>
    %72 = arith.mulf %70, %71 : vector<8x8xf32>
    %cst_27 = arith.constant -3.40282347E+38 : f32
    %73 = vector.broadcast %cst_27 : f32 to vector<8x8xf32>
    %74 = arith.select %40, %72, %73 : vector<8x8xi1>, vector<8x8xf32>
    %cst_28 = arith.constant dense<0xFF800000> : vector<8xf32>
    %75 = vector.multi_reduction <maximumf>, %74, %cst_28 [1] : vector<8x8xf32> to vector<8xf32>
    %76 = vector.shape_cast %75 : vector<8xf32> to vector<8x1xf32>
    %77 = vector.broadcast %76 : vector<8x1xf32> to vector<8x8xf32>
    %78 = arith.subf %74, %77 : vector<8x8xf32>
    %79 = math.exp %78 : vector<8x8xf32>
    %cst_29 = arith.constant dense<0.000000e+00> : vector<8xf32>
    %80 = vector.multi_reduction <add>, %79, %cst_29 [1] : vector<8x8xf32> to vector<8xf32>
    %81 = vector.shape_cast %80 : vector<8xf32> to vector<8x1xf32>
    %82 = tpu.reciprocal %81 {approx = true} : vector<8x1xf32> -> vector<8x1xf32>
    %83 = vector.broadcast %82 : vector<8x1xf32> to vector<8x8xf32>
    %84 = arith.mulf %79, %83 : vector<8x8xf32>
    %85 = arith.truncf %84 : vector<8x8xf32> to vector<8x8xbf16>
    %cst_30 = arith.constant dense<0.000000e+00> : vector<8x16xf32>
    %86 = tpu.matmul %85, %69, %cst_30 {dimension_numbers = #tpu.dot_dimension_numbers<[1], [0], [0], [1], [0, 0, 1, 1], [], []>} : vector<8x8xbf16>, vector<8x16xbf16>, vector<8x16xf32> -> vector<8x16xf32>
    %87 = tpu.concatenate %63, %86 in 1 : vector<8x16xf32>, vector<8x16xf32> -> vector<8x32xf32>
    %88 = arith.truncf %87 : vector<8x32xf32> to vector<8x32xbf16>
    %c0_31 = arith.constant 0 : index
    %c0_32 = arith.constant 0 : index
    %89 = vector.load %arg7[%c0_31, %c0_32] : memref<32x32xbf16, #tpu.memory_space<vmem>>, vector<32x32xbf16>
    %cst_33 = arith.constant dense<0.000000e+00> : vector<8x32xf32>
    %90 = tpu.matmul %88, %89, %cst_33 {dimension_numbers = #tpu.dot_dimension_numbers<[1], [0], [0], [1], [0, 0, 1, 1], [], []>} : vector<8x32xbf16>, vector<32x32xbf16>, vector<8x32xf32> -> vector<8x32xf32>
    %c0_34 = arith.constant 0 : index
    %c0_35 = arith.constant 0 : index
    %91 = vector.load %arg8[%c0_34, %c0_35] : memref<1x32xf32, #tpu.memory_space<vmem>>, vector<1x32xf32>
    %92 = vector.broadcast %91 : vector<1x32xf32> to vector<8x32xf32>
    %93 = arith.addf %90, %92 : vector<8x32xf32>
    %94 = arith.addf %1, %93 : vector<8x32xf32>
    %c0_36 = arith.constant 0 : index
    %c0_37 = arith.constant 0 : index
    %95 = vector.load %arg9[%c0_36, %c0_37] : memref<1x32xf32, #tpu.memory_space<vmem>>, vector<1x32xf32>
    %c0_38 = arith.constant 0 : index
    %c0_39 = arith.constant 0 : index
    %96 = vector.load %arg10[%c0_38, %c0_39] : memref<1x32xf32, #tpu.memory_space<vmem>>, vector<1x32xf32>
    %cst_40 = arith.constant dense<0.000000e+00> : vector<8xf32>
    %97 = vector.multi_reduction <add>, %94, %cst_40 [1] : vector<8x32xf32> to vector<8xf32>
    %98 = vector.shape_cast %97 : vector<8xf32> to vector<8x1xf32>
    %cst_41 = arith.constant 3.200000e+01 : f32
    %99 = vector.broadcast %cst_41 : f32 to vector<8x1xf32>
    %100 = arith.divf %98, %99 : vector<8x1xf32>
    %101 = vector.broadcast %100 : vector<8x1xf32> to vector<8x32xf32>
    %102 = arith.subf %94, %101 : vector<8x32xf32>
    %103 = arith.mulf %102, %102 : vector<8x32xf32>
    %cst_42 = arith.constant dense<0.000000e+00> : vector<8xf32>
    %104 = vector.multi_reduction <add>, %103, %cst_42 [1] : vector<8x32xf32> to vector<8xf32>
    %105 = vector.shape_cast %104 : vector<8xf32> to vector<8x1xf32>
    %cst_43 = arith.constant 3.200000e+01 : f32
    %106 = vector.broadcast %cst_43 : f32 to vector<8x1xf32>
    %107 = arith.divf %105, %106 : vector<8x1xf32>
    %108 = vector.broadcast %100 : vector<8x1xf32> to vector<8x32xf32>
    %109 = arith.subf %94, %108 : vector<8x32xf32>
    %cst_44 = arith.constant 9.99999974E-6 : f32
    %110 = vector.broadcast %cst_44 : f32 to vector<8x1xf32>
    %111 = arith.addf %107, %110 : vector<8x1xf32>
    %112 = math.rsqrt %111 : vector<8x1xf32>
    %113 = vector.broadcast %112 : vector<8x1xf32> to vector<8x32xf32>
    %114 = arith.mulf %109, %113 : vector<8x32xf32>
    %115 = vector.broadcast %95 : vector<1x32xf32> to vector<8x32xf32>
    %116 = arith.mulf %114, %115 : vector<8x32xf32>
    %117 = vector.broadcast %96 : vector<1x32xf32> to vector<8x32xf32>
    %118 = arith.addf %116, %117 : vector<8x32xf32>
    %119 = arith.truncf %118 : vector<8x32xf32> to vector<8x32xbf16>
    %c0_45 = arith.constant 0 : index
    %c0_46 = arith.constant 0 : index
    %120 = vector.load %arg11[%c0_45, %c0_46] : memref<32x128xbf16, #tpu.memory_space<vmem>>, vector<32x128xbf16>
    %cst_47 = arith.constant dense<0.000000e+00> : vector<8x128xf32>
    %121 = tpu.matmul %119, %120, %cst_47 {dimension_numbers = #tpu.dot_dimension_numbers<[1], [0], [0], [1], [0, 0, 1, 1], [], []>} : vector<8x32xbf16>, vector<32x128xbf16>, vector<8x128xf32> -> vector<8x128xf32>
    %c0_48 = arith.constant 0 : index
    %c0_49 = arith.constant 0 : index
    %122 = vector.load %arg12[%c0_48, %c0_49] : memref<1x128xf32, #tpu.memory_space<vmem>>, vector<1x128xf32>
    %123 = vector.broadcast %122 : vector<1x128xf32> to vector<8x128xf32>
    %124 = arith.addf %121, %123 : vector<8x128xf32>
    %cst_50 = arith.constant 5.000000e-01 : f32
    %125 = vector.broadcast %cst_50 : f32 to vector<8x128xf32>
    %126 = arith.mulf %125, %124 : vector<8x128xf32>
    %cst_51 = arith.constant 4.471500e-02 : f32
    %127 = vector.broadcast %cst_51 : f32 to vector<8x128xf32>
    %128 = arith.mulf %127, %124 : vector<8x128xf32>
    %129 = arith.mulf %128, %124 : vector<8x128xf32>
    %130 = arith.mulf %129, %124 : vector<8x128xf32>
    %131 = arith.addf %124, %130 : vector<8x128xf32>
    %cst_52 = arith.constant 0.797884583 : f32
    %132 = vector.broadcast %cst_52 : f32 to vector<8x128xf32>
    %133 = arith.mulf %132, %131 : vector<8x128xf32>
    %134 = math.tanh %133 : vector<8x128xf32>
    %cst_53 = arith.constant 1.000000e+00 : f32
    %135 = vector.broadcast %cst_53 : f32 to vector<8x128xf32>
    %136 = arith.addf %135, %134 : vector<8x128xf32>
    %137 = arith.mulf %126, %136 : vector<8x128xf32>
    %138 = arith.truncf %137 : vector<8x128xf32> to vector<8x128xbf16>
    %c0_54 = arith.constant 0 : index
    %c0_55 = arith.constant 0 : index
    %139 = vector.load %arg13[%c0_54, %c0_55] : memref<128x32xbf16, #tpu.memory_space<vmem>>, vector<128x32xbf16>
    %cst_56 = arith.constant dense<0.000000e+00> : vector<8x32xf32>
    %140 = tpu.matmul %138, %139, %cst_56 {dimension_numbers = #tpu.dot_dimension_numbers<[1], [0], [0], [1], [0, 0, 1, 1], [], []>} : vector<8x128xbf16>, vector<128x32xbf16>, vector<8x32xf32> -> vector<8x32xf32>
    %c0_57 = arith.constant 0 : index
    %c0_58 = arith.constant 0 : index
    %141 = vector.load %arg14[%c0_57, %c0_58] : memref<1x32xf32, #tpu.memory_space<vmem>>, vector<1x32xf32>
    %142 = vector.broadcast %141 : vector<1x32xf32> to vector<8x32xf32>
    %143 = arith.addf %140, %142 : vector<8x32xf32>
    %144 = arith.addf %94, %143 : vector<8x32xf32>
    %c0_59 = arith.constant 0 : index
    %c0_60 = arith.constant 0 : index
    %c0_61 = arith.constant 0 : index
    %145 = vector.load %arg15[%c0_59, %c0_60, %c0_61] : memref<1x8x32xf32, #tpu.memory_space<vmem>>, vector<1x8x32xf32>
    %146 = vector.shape_cast %145 : vector<1x8x32xf32> to vector<8x32xf32>
    %147 = vector.shape_cast %144 : vector<8x32xf32> to vector<1x8x32xf32>
    tpu.vector_store %arg15[%c0_59, %c0_60, %c0_61], %147 {strides = array<i32>} : memref<1x8x32xf32, #tpu.memory_space<vmem>>, vector<1x8x32xf32>,
    return
  }
  func.func @transform_0(%arg0: i32) -> (i32, i32, i32) {
    %c0_i32 = arith.constant 0 : i32
    %c0_i32_0 = arith.constant 0 : i32
    %c0_i32_1 = arith.constant 0 : i32
    return %arg0, %c0_i32, %c0_i32_0 : i32, i32, i32
  }
  func.func @transform_1(%arg0: i32) -> (i32, i32, i32) {
    %c0_i32 = arith.constant 0 : i32
    %c0_i32_0 = arith.constant 0 : i32
    %c0_i32_1 = arith.constant 0 : i32
    return %arg0, %c0_i32, %c0_i32_0 : i32, i32, i32
  }
  func.func @transform_2(%arg0: i32) -> (i32, i32) {
    %c0_i32 = arith.constant 0 : i32
    %c0_i32_0 = arith.constant 0 : i32
    %c0_i32_1 = arith.constant 0 : i32
    return %c0_i32, %c0_i32_0 : i32, i32
  }
  func.func @transform_3(%arg0: i32) -> (i32, i32) {
    %c0_i32 = arith.constant 0 : i32
    %c0_i32_0 = arith.constant 0 : i32
    %c0_i32_1 = arith.constant 0 : i32
    return %c0_i32, %c0_i32_0 : i32, i32
  }
  func.func @transform_4(%arg0: i32) -> (i32, i32) {
    %c0_i32 = arith.constant 0 : i32
    %c0_i32_0 = arith.constant 0 : i32
    %c0_i32_1 = arith.constant 0 : i32
    return %c0_i32, %c0_i32_0 : i32, i32
  }
  func.func @transform_5(%arg0: i32) -> (i32, i32) {
    %c0_i32 = arith.constant 0 : i32
    %c0_i32_0 = arith.constant 0 : i32
    %c0_i32_1 = arith.constant 0 : i32
    return %c0_i32, %c0_i32_0 : i32, i32
  }
  func.func @transform_6(%arg0: i32) -> (i32, i32) {
    %c0_i32 = arith.constant 0 : i32
    %c0_i32_0 = arith.constant 0 : i32
    %c0_i32_1 = arith.constant 0 : i32
    return %c0_i32, %c0_i32_0 : i32, i32
  }
  func.func @transform_7(%arg0: i32) -> (i32, i32) {
    %c0_i32 = arith.constant 0 : i32
    %c0_i32_0 = arith.constant 0 : i32
    %c0_i32_1 = arith.constant 0 : i32
    return %c0_i32, %c0_i32_0 : i32, i32
  }
  func.func @transform_8(%arg0: i32) -> (i32, i32) {
    %c0_i32 = arith.constant 0 : i32
    %c0_i32_0 = arith.constant 0 : i32
    %c0_i32_1 = arith.constant 0 : i32
    return %c0_i32, %c0_i32_0 : i32, i32
  }
  func.func @transform_9(%arg0: i32) -> (i32, i32) {
    %c0_i32 = arith.constant 0 : i32
    %c0_i32_0 = arith.constant 0 : i32
    %c0_i32_1 = arith.constant 0 : i32
    return %c0_i32, %c0_i32_0 : i32, i32
  }
  func.func @transform_10(%arg0: i32) -> (i32, i32) {
    %c0_i32 = arith.constant 0 : i32
    %c0_i32_0 = arith.constant 0 : i32
    %c0_i32_1 = arith.constant 0 : i32
    return %c0_i32, %c0_i32_0 : i32, i32
  }
  func.func @transform_11(%arg0: i32) -> (i32, i32) {
    %c0_i32 = arith.constant 0 : i32
    %c0_i32_0 = arith.constant 0 : i32
    %c0_i32_1 = arith.constant 0 : i32
    return %c0_i32, %c0_i32_0 : i32, i32
  }
  func.func @transform_12(%arg0: i32) -> (i32, i32) {
    %c0_i32 = arith.constant 0 : i32
    %c0_i32_0 = arith.constant 0 : i32
    %c0_i32_1 = arith.constant 0 : i32
    return %c0_i32, %c0_i32_0 : i32, i32
  }
  func.func @transform_13(%arg0: i32) -> (i32, i32) {
    %c0_i32 = arith.constant 0 : i32
    %c0_i32_0 = arith.constant 0 : i32
    %c0_i32_1 = arith.constant 0 : i32
    return %c0_i32, %c0_i32_0 : i32, i32
  }
  func.func @transform_14(%arg0: i32) -> (i32, i32, i32) {
    %c0_i32 = arith.constant 0 : i32
    %c0_i32_0 = arith.constant 0 : i32
    %c0_i32_1 = arith.constant 0 : i32
    return %arg0, %c0_i32, %c0_i32_0 : i32, i32, i32
  }
}

module attributes {stable_mosaic.version = 11 : i64} {
  func.func @_head_kernel(%arg0: memref<2x32xf32, #tpu.memory_space<vmem>>, %arg1: memref<1x32xf32, #tpu.memory_space<vmem>>, %arg2: memref<1x32xf32, #tpu.memory_space<vmem>>, %arg3: memref<32x16xbf16, #tpu.memory_space<vmem>>, %arg4: memref<16x16xbf16, #tpu.memory_space<vmem>>, %arg5: memref<1x16xf32, #tpu.memory_space<vmem>>, %arg6: memref<1x16xf32, #tpu.memory_space<vmem>>, %arg7: memref<2x16xf32, #tpu.memory_space<vmem>>) attributes {dimension_semantics = [], scalar_prefetch = 0 : i64, scratch_operands = 0 : i64, tpu.core_type = #tpu.core_type<tc>} {
    %c0 = arith.constant 0 : index
    %c0_0 = arith.constant 0 : index
    %0 = vector.load %arg0[%c0, %c0_0] : memref<2x32xf32, #tpu.memory_space<vmem>>, vector<2x32xf32>
    %c0_1 = arith.constant 0 : index
    %c0_2 = arith.constant 0 : index
    %1 = vector.load %arg1[%c0_1, %c0_2] : memref<1x32xf32, #tpu.memory_space<vmem>>, vector<1x32xf32>
    %c0_3 = arith.constant 0 : index
    %c0_4 = arith.constant 0 : index
    %2 = vector.load %arg2[%c0_3, %c0_4] : memref<1x32xf32, #tpu.memory_space<vmem>>, vector<1x32xf32>
    %cst = arith.constant dense<0.000000e+00> : vector<2xf32>
    %3 = vector.multi_reduction <add>, %0, %cst [1] : vector<2x32xf32> to vector<2xf32>
    %4 = vector.shape_cast %3 : vector<2xf32> to vector<2x1xf32>
    %cst_5 = arith.constant 3.200000e+01 : f32
    %5 = vector.broadcast %cst_5 : f32 to vector<2x1xf32>
    %6 = arith.divf %4, %5 : vector<2x1xf32>
    %7 = vector.broadcast %6 : vector<2x1xf32> to vector<2x32xf32>
    %8 = arith.subf %0, %7 : vector<2x32xf32>
    %9 = arith.mulf %8, %8 : vector<2x32xf32>
    %cst_6 = arith.constant dense<0.000000e+00> : vector<2xf32>
    %10 = vector.multi_reduction <add>, %9, %cst_6 [1] : vector<2x32xf32> to vector<2xf32>
    %11 = vector.shape_cast %10 : vector<2xf32> to vector<2x1xf32>
    %cst_7 = arith.constant 3.200000e+01 : f32
    %12 = vector.broadcast %cst_7 : f32 to vector<2x1xf32>
    %13 = arith.divf %11, %12 : vector<2x1xf32>
    %14 = vector.broadcast %6 : vector<2x1xf32> to vector<2x32xf32>
    %15 = arith.subf %0, %14 : vector<2x32xf32>
    %cst_8 = arith.constant 9.99999974E-6 : f32
    %16 = vector.broadcast %cst_8 : f32 to vector<2x1xf32>
    %17 = arith.addf %13, %16 : vector<2x1xf32>
    %18 = math.rsqrt %17 : vector<2x1xf32>
    %19 = vector.broadcast %18 : vector<2x1xf32> to vector<2x32xf32>
    %20 = arith.mulf %15, %19 : vector<2x32xf32>
    %21 = vector.broadcast %1 : vector<1x32xf32> to vector<2x32xf32>
    %22 = arith.mulf %20, %21 : vector<2x32xf32>
    %23 = vector.broadcast %2 : vector<1x32xf32> to vector<2x32xf32>
    %24 = arith.addf %22, %23 : vector<2x32xf32>
    %25 = arith.truncf %24 : vector<2x32xf32> to vector<2x32xbf16>
    %c0_9 = arith.constant 0 : index
    %c0_10 = arith.constant 0 : index
    %26 = vector.load %arg3[%c0_9, %c0_10] : memref<32x16xbf16, #tpu.memory_space<vmem>>, vector<32x16xbf16>
    %cst_11 = arith.constant dense<0.000000e+00> : vector<2x16xf32>
    %27 = tpu.matmul %25, %26, %cst_11 {dimension_numbers = #tpu.dot_dimension_numbers<[1], [0], [0], [1], [0, 0, 1, 1], [], []>} : vector<2x32xbf16>, vector<32x16xbf16>, vector<2x16xf32> -> vector<2x16xf32>
    %cst_12 = arith.constant 5.000000e-01 : f32
    %28 = vector.broadcast %cst_12 : f32 to vector<2x16xf32>
    %29 = arith.mulf %28, %27 : vector<2x16xf32>
    %cst_13 = arith.constant 0.707106769 : f32
    %30 = vector.broadcast %cst_13 : f32 to vector<2x16xf32>
    %31 = arith.mulf %27, %30 : vector<2x16xf32>
    %32 = math.absf %31 : vector<2x16xf32>
    %cst_14 = arith.constant 0.327591091 : f32
    %33 = vector.broadcast %cst_14 : f32 to vector<2x16xf32>
    %34 = arith.mulf %33, %32 : vector<2x16xf32>
    %cst_15 = arith.constant 1.000000e+00 : f32
    %35 = vector.broadcast %cst_15 : f32 to vector<2x16xf32>
    %36 = arith.addf %35, %34 : vector<2x16xf32>
    %cst_16 = arith.constant 1.000000e+00 : f32
    %37 = vector.broadcast %cst_16 : f32 to vector<2x16xf32>
    %38 = arith.divf %37, %36 : vector<2x16xf32>
    %cst_17 = arith.constant 1.06140542 : f32
    %39 = vector.broadcast %cst_17 : f32 to vector<2x16xf32>
    %40 = arith.mulf %39, %38 : vector<2x16xf32>
    %cst_18 = arith.constant -1.45315206 : f32
    %41 = vector.broadcast %cst_18 : f32 to vector<2x16xf32>
    %42 = arith.addf %40, %41 : vector<2x16xf32>
    %43 = arith.mulf %42, %38 : vector<2x16xf32>
    %cst_19 = arith.constant 1.42141378 : f32
    %44 = vector.broadcast %cst_19 : f32 to vector<2x16xf32>
    %45 = arith.addf %43, %44 : vector<2x16xf32>
    %46 = arith.mulf %45, %38 : vector<2x16xf32>
    %cst_20 = arith.constant -0.284496725 : f32
    %47 = vector.broadcast %cst_20 : f32 to vector<2x16xf32>
    %48 = arith.addf %46, %47 : vector<2x16xf32>
    %49 = arith.mulf %48, %38 : vector<2x16xf32>
    %cst_21 = arith.constant 0.254829586 : f32
    %50 = vector.broadcast %cst_21 : f32 to vector<2x16xf32>
    %51 = arith.addf %49, %50 : vector<2x16xf32>
    %52 = arith.mulf %51, %38 : vector<2x16xf32>
    %cst_22 = arith.constant 0.000000e+00 : f32
    %53 = vector.broadcast %cst_22 : f32 to vector<2x16xf32>
    %54 = arith.subf %53, %32 : vector<2x16xf32>
    %55 = arith.mulf %54, %32 : vector<2x16xf32>
    %56 = math.exp %55 : vector<2x16xf32>
    %57 = arith.mulf %52, %56 : vector<2x16xf32>
    %cst_23 = arith.constant 1.000000e+00 : f32
    %58 = vector.broadcast %cst_23 : f32 to vector<2x16xf32>
    %59 = arith.subf %58, %57 : vector<2x16xf32>
    %cst_24 = arith.constant 0.000000e+00 : f32
    %60 = vector.broadcast %cst_24 : f32 to vector<2x16xf32>
    %61 = arith.cmpf oge, %31, %60 : vector<2x16xf32>
    %cst_25 = arith.constant 0.000000e+00 : f32
    %62 = vector.broadcast %cst_25 : f32 to vector<2x16xf32>
    %63 = arith.subf %62, %59 : vector<2x16xf32>
    %64 = arith.select %61, %59, %63 : vector<2x16xi1>, vector<2x16xf32>
    %cst_26 = arith.constant 1.000000e+00 : f32
    %65 = vector.broadcast %cst_26 : f32 to vector<2x16xf32>
    %66 = arith.addf %65, %64 : vector<2x16xf32>
    %67 = arith.mulf %29, %66 : vector<2x16xf32>
    %68 = arith.truncf %67 : vector<2x16xf32> to vector<2x16xbf16>
    %c0_27 = arith.constant 0 : index
    %c0_28 = arith.constant 0 : index
    %69 = vector.load %arg4[%c0_27, %c0_28] : memref<16x16xbf16, #tpu.memory_space<vmem>>, vector<16x16xbf16>
    %cst_29 = arith.constant dense<0.000000e+00> : vector<2x16xf32>
    %70 = tpu.matmul %68, %69, %cst_29 {dimension_numbers = #tpu.dot_dimension_numbers<[1], [0], [0], [1], [0, 0, 1, 1], [], []>} : vector<2x16xbf16>, vector<16x16xbf16>, vector<2x16xf32> -> vector<2x16xf32>
    %71 = arith.addf %27, %70 : vector<2x16xf32>
    %c0_30 = arith.constant 0 : index
    %c0_31 = arith.constant 0 : index
    %72 = vector.load %arg5[%c0_30, %c0_31] : memref<1x16xf32, #tpu.memory_space<vmem>>, vector<1x16xf32>
    %c0_32 = arith.constant 0 : index
    %c0_33 = arith.constant 0 : index
    %73 = vector.load %arg6[%c0_32, %c0_33] : memref<1x16xf32, #tpu.memory_space<vmem>>, vector<1x16xf32>
    %cst_34 = arith.constant dense<0.000000e+00> : vector<2xf32>
    %74 = vector.multi_reduction <add>, %71, %cst_34 [1] : vector<2x16xf32> to vector<2xf32>
    %75 = vector.shape_cast %74 : vector<2xf32> to vector<2x1xf32>
    %cst_35 = arith.constant 1.600000e+01 : f32
    %76 = vector.broadcast %cst_35 : f32 to vector<2x1xf32>
    %77 = arith.divf %75, %76 : vector<2x1xf32>
    %78 = vector.broadcast %77 : vector<2x1xf32> to vector<2x16xf32>
    %79 = arith.subf %71, %78 : vector<2x16xf32>
    %80 = arith.mulf %79, %79 : vector<2x16xf32>
    %cst_36 = arith.constant dense<0.000000e+00> : vector<2xf32>
    %81 = vector.multi_reduction <add>, %80, %cst_36 [1] : vector<2x16xf32> to vector<2xf32>
    %82 = vector.shape_cast %81 : vector<2xf32> to vector<2x1xf32>
    %cst_37 = arith.constant 1.600000e+01 : f32
    %83 = vector.broadcast %cst_37 : f32 to vector<2x1xf32>
    %84 = arith.divf %82, %83 : vector<2x1xf32>
    %85 = vector.broadcast %77 : vector<2x1xf32> to vector<2x16xf32>
    %86 = arith.subf %71, %85 : vector<2x16xf32>
    %cst_38 = arith.constant 9.99999974E-6 : f32
    %87 = vector.broadcast %cst_38 : f32 to vector<2x1xf32>
    %88 = arith.addf %84, %87 : vector<2x1xf32>
    %89 = math.rsqrt %88 : vector<2x1xf32>
    %90 = vector.broadcast %89 : vector<2x1xf32> to vector<2x16xf32>
    %91 = arith.mulf %86, %90 : vector<2x16xf32>
    %92 = vector.broadcast %72 : vector<1x16xf32> to vector<2x16xf32>
    %93 = arith.mulf %91, %92 : vector<2x16xf32>
    %94 = vector.broadcast %73 : vector<1x16xf32> to vector<2x16xf32>
    %95 = arith.addf %93, %94 : vector<2x16xf32>
    %96 = arith.mulf %95, %95 : vector<2x16xf32>
    %cst_39 = arith.constant dense<0.000000e+00> : vector<2xf32>
    %97 = vector.multi_reduction <add>, %96, %cst_39 [1] : vector<2x16xf32> to vector<2xf32>
    %98 = vector.shape_cast %97 : vector<2xf32> to vector<2x1xf32>
    %99 = math.rsqrt %98 : vector<2x1xf32>
    %100 = vector.broadcast %99 : vector<2x1xf32> to vector<2x16xf32>
    %101 = arith.mulf %95, %100 : vector<2x16xf32>
    %c0_40 = arith.constant 0 : index
    %c0_41 = arith.constant 0 : index
    %102 = vector.load %arg7[%c0_40, %c0_41] : memref<2x16xf32, #tpu.memory_space<vmem>>, vector<2x16xf32>
    tpu.vector_store %arg7[%c0_40, %c0_41], %101 {strides = array<i32>} : memref<2x16xf32, #tpu.memory_space<vmem>>, vector<2x16xf32>,
    return
  }
}

</mosaic_0001>

<bundles_post_ra>
// kernel: text_encoder_gpt2_forward.5
= control target key start
LH: loop header
LB: loop body
LE: loop exit
PB: predicated region body
PF: predicated region fallthrough
CT: control target
= control target key end

     0   :  { %vm31_vm0 = vcmask 254976   ;;  %s382_s0 = inlined_call_operand.vmem [shape: f32[2,32], index: 0, kind: input, shape index: {}]   ;;  %s383_s1 = inlined_call_operand.vmem [shape: f32[1,32], index: 1, kind: input, shape index: {}]   ;;  %s384_s2 = inlined_call_operand.vmem [shape: f32[1,32], index: 2, kind: input, shape index: {}]   ;;  %s385_s3 = inlined_call_operand.vmem [shape: bf16[32,16], index: 3, kind: input, shape index: {}]   ;;  %s386_s4 = inlined_call_operand.vmem [shape: bf16[16,16], index: 4, kind: input, shape index: {}]   ;;  %s387_s5 = inlined_call_operand.vmem [shape: f32[1,16], index: 5, kind: input, shape index: {}]   ;;  %s388_s6 = inlined_call_operand.vmem [shape: f32[1,16], index: 6, kind: input, shape index: {}]   ;;  %s389_s7 = inlined_call_operand.hbm [shape: f32[2,16], index: 7, kind: output, shape index: {}]  }
   0x1   :  { %v28_v0 = vld [vmem:[%s382_s0] sm:$0x3] }
   0x2   :  { %v32_v1 = vsel %vm31_vm0, %v28_v0, 0.0 }
   0x3   :  { %33 = vadd.xlane.f32.xlu0 %v32_v1 }
   0x4   :  { %12 = vsyncpa [#allocation3], 0  ;;  %v306_v2 = vmov 32.0   ;;  %v257_v14 = vld [vmem:[%s385_s3 + $0x8] sm:$0xff]  ;;  %v256_v15 = vld [vmem:[%s385_s3] sm:$0xff]  ;;  %vm86_vm5 = vcmask 261120  }
   0x5   :  { %266 = vrcp.f32 %v306_v2  ;;  %96 = vmatpush.bf16.msra.mxu0 %v257_v14  ;;  %v262_v25 = vld [vmem:[%s383_s1] ss:$0 sm:$0xff]  ;;  %vm152_vm11 = vcmask 130048   ;;  %vm172_vm12 = vcmask 123904   ;;  %s233_s14 = sshll.u32 %s389_s7, 4  ;;  %s234_s14 = int_to_ptr.hbm [resolvable:$true] %s233_s14 }
   0x6   :  { %v263_v28 = vld [vmem:[%s384_s2] ss:$0 sm:$0xff] }
   0x7   :  { %v258_v32 = vld [vmem:[%s386_s4] sm:$0xff] }
   0x8   :  { %163 = vmatpush.bf16.msra.mxu1 %v258_v32 }
   0x9   :  { %97 = vmatpush.bf16.msra.mxu0 %v256_v15 }
   0xb   :  { %v267_v3 = vpop.eup %266 }
   0xc   :  { %v36_v4 = vmul.f32 32.0, %v267_v3  ;;  %vm40_vm1 = vweird.f32 %v267_v3 }
   0xe   :  { %v37_v5 = vsub.f32 1.0, %v36_v4 }
  0x10   :  { %v38_v6 = vmul.f32 %v267_v3, %v37_v5 }
  0x12   :  { %v39_v7 = vadd.f32 %v267_v3, %v38_v6 }
  0x14   :  { %v41_v8 = vsel %vm40_vm1, %v267_v3, %v39_v7 }
  0x76   :  { %v34_v9 = vpop.xlane.xlu0 %33 }
  0x77   :  { %v42_v10 = vmul.f32 %v41_v8, %v34_v9 }
  0x79   :  { %v43_v11 = vsub.f32 %v28_v0, %v42_v10  ;;  %v307_v10 = vmov 16.0  }
  0x7b   :  { %v44_v12 = vmul.f32 %v43_v11, %v43_v11 }
  0x7d   :  { %v45_v13 = vsel %vm31_vm0, %v44_v12, 0.0 }
  0x7e   :  { %46 = vadd.xlane.f32.xlu0 %v45_v13 }
  0xf1   :  { %v47_v16 = vpop.xlane.xlu0 %46 }
  0xf2   :  { %v48_v17 = vmul.f32 %v47_v16, %v41_v8 }
  0xf4   :  { %v49_v18 = vadd.f32 1e-05, %v48_v17 }
  0xf6   :  { %268 = vrsqrt.f32 %v49_v18  ;;  %vm56_vm3 = vweird.f32 %v49_v18 }
  0xfc   :  { %v269_v19 = vpop.eup %268 }
  0xfd   :  { %v51_v20 = vmul.f32 %v269_v19, %v49_v18  ;;  %vm57_vm2 = vweird.f32 %v269_v19 }
  0xfe   :  { %vm58_vm4 = vmor %vm56_vm3, %vm57_vm2 }
  0xff   :  { %v52_v21 = vmul.f32 %v269_v19, %v51_v20 }
 0x101   :  { %v53_v22 = vmul.f32 0.5, %v52_v21 }
 0x103   :  { %v54_v23 = vsub.f32 1.5, %v53_v22 }
 0x105   :  { %v55_v24 = vmul.f32 %v269_v19, %v54_v23 }
 0x107   :  { %v59_v26 = vsel %vm58_vm4, %v269_v19, %v55_v24 }
 0x108   :  { %v60_v27 = vmul.f32 %v59_v26, %v43_v11 }
 0x10a   :  { %v64_v29 = vmul.f32 %v262_v25, %v60_v27 }
 0x10c   :  { %v68_v30 = vadd.f32 %v263_v28, %v64_v29 }
 0x10e   :  { %v69_v31 = vpack.c.bf16 %v68_v30, %v68_v30 }
 0x110   :  { %250 = vmatmul.msk.bf16.vlgmr.msra.gmra.mxu0 %vm86_vm5, %v69_v31  ;;  %v264_v31 = vld [vmem:[%s387_s5] ss:$0 sm:$0xff]  ;;  %s308_s5 = smov [#allocation2]  }
 0x111   :  { %s231_s12 = sshll.u32 %s308_s5, 4  ;;  %s232_s12 = int_to_ptr.vmem [resolvable:$true] %s231_s12 }
 0x18d   :  { %v99_v33 = vpop.f32.mrf.mxu0 }
 0x18e   :  { %v104_v34 = vmul.f32 0.70710677, %v99_v33  ;;  %v103_v2 = vmul.f32 0.5, %v99_v33 }
 0x190   :  { %v105_v35 = vand.u32 2147483647, %v104_v34  ;;  %vm138_vm10 = vcmp.ge.f32.partialorder %v104_v34, 0.0  ;;  %v265_v34 = vld [vmem:[%s388_s6] ss:$0 sm:$0xff] }
 0x192   :  { %v106_v36 = vmul.f32 0.3275911, %v105_v35  ;;  %v132_v48 = vsub.f32 0.0, %v105_v35 }
 0x194   :  { %v107_v37 = vadd.f32 1.0, %v106_v36  ;;  %v133_v52 = vmul.f32 %v132_v48, %v105_v35 }
 0x195   :  { %v101_v38 = vpop.f32.mrf.mxu0 }
 0x196   :  { %270 = vrcp.f32 %v107_v37  ;;  %v119_v42 = vand.u32 2147483648, %v107_v37  ;;  %v117_v44 = vand.u32 2147483647, %v107_v37  ;;  %vm113_vm7 = vweird.f32 %v107_v37 }
 0x197   :  { %v134_v55 = vmul.f32 1.442695, %v133_v52 }
 0x198   :  { %v120_v46 = vor.u32 1.1754944e-38, %v119_v42  ;;  %vm118_vm9 = vcmp.eq.f32.partialorder %v117_v44, 8.507059e+37 }
 0x199   :  { %272 = vpow2.f32 %v134_v55 }
 0x19a   :  { %274 = vrcp.f32 %v307_v10 }
 0x19c   :  { %v271_v39 = vpop.eup %270 }
 0x19d   :  { %v109_v40 = vmul.f32 %v271_v39, %v107_v37  ;;  %vm114_vm6 = vweird.f32 %v271_v39 }
 0x19e   :  { %vm115_vm8 = vmor %vm113_vm7, %vm114_vm6 }
 0x19f   :  { %v110_v41 = vsub.f32 1.0, %v109_v40  ;;  %v273_v61 = vpop.eup %272 }
 0x1a0   :  { %v275_v11 = vpop.eup %274 }
 0x1a1   :  { %v111_v43 = vmul.f32 %v271_v39, %v110_v41  ;;  %v177_v12 = vmul.f32 16.0, %v275_v11  ;;  %vm181_vm13 = vweird.f32 %v275_v11 }
 0x1a3   :  { %v112_v45 = vadd.f32 %v271_v39, %v111_v43  ;;  %v178_v13 = vsub.f32 1.0, %v177_v12 }
 0x1a5   :  { %v116_v47 = vsel %vm115_vm8, %v271_v39, %v112_v45  ;;  %v179_v14 = vmul.f32 %v275_v11, %v178_v13 }
 0x1a6   :  { %v121_v49 = vsel %vm118_vm9, %v120_v46, %v116_v47 }
 0x1a7   :  { %v123_v50 = vmul.f32 1.0614054, %v121_v49  ;;  %v180_v15 = vadd.f32 %v275_v11, %v179_v14 }
 0x1a9   :  { %v124_v51 = vadd.f32 -1.4531521, %v123_v50  ;;  %v182_v16 = vsel %vm181_vm13, %v275_v11, %v180_v15 }
 0x1ab   :  { %v125_v53 = vmul.f32 %v124_v51, %v121_v49 }
 0x1ad   :  { %v126_v54 = vadd.f32 1.4214138, %v125_v53 }
 0x1af   :  { %v127_v56 = vmul.f32 %v126_v54, %v121_v49 }
 0x1b1   :  { %v128_v57 = vadd.f32 -0.28449672, %v127_v56 }
 0x1b3   :  { %v129_v58 = vmul.f32 %v128_v57, %v121_v49 }
 0x1b5   :  { %v130_v59 = vadd.f32 0.2548296, %v129_v58 }
 0x1b7   :  { %v131_v60 = vmul.f32 %v130_v59, %v121_v49 }
 0x1b9   :  { %v136_v62 = vmul.f32 %v273_v61, %v131_v60 }
 0x1bb   :  { %v137_v63 = vsub.f32 1.0, %v136_v62 }
 0x1bd   :  { %v139_v0 = vsub.f32 0.0, %v137_v63 }
 0x1bf   :  { %v140_v1 = vsel %vm138_vm10, %v137_v63, %v139_v0 }
 0x1c0   :  { %v141_v3 = vadd.f32 1.0, %v140_v1 }
 0x1c2   :  { %v142_v4 = vmul.f32 %v141_v3, %v103_v2 }
 0x1c4   :  { %v143_v5 = vpack.c.bf16 %v142_v4, %v142_v4 }
 0x1c6   :  { %255 = vmatmul.msk.bf16.vlgmr.msra.gmra.mxu1 %vm152_vm11, %v143_v5 }
 0x243   :  { %v165_v6 = vpop.f32.mrf.mxu1 }
 0x244   :  { %v169_v7 = vadd.f32 %v165_v6, %v99_v33 }
 0x246   :  { %v173_v8 = vsel %vm172_vm12, %v169_v7, 0.0 }
 0x247   :  { %174 = vadd.xlane.f32.xlu1 %v173_v8 }
 0x24b   :  { %v167_v9 = vpop.f32.mrf.mxu1 }
 0x2ba   :  { %v175_v17 = vpop.xlane.xlu1 %174 }
 0x2bb   :  { %v183_v18 = vmul.f32 %v182_v16, %v175_v17 }
 0x2bd   :  { %v184_v19 = vsub.f32 %v169_v7, %v183_v18 }
 0x2bf   :  { %v185_v20 = vmul.f32 %v184_v19, %v184_v19 }
 0x2c1   :  { %v186_v21 = vsel %vm172_vm12, %v185_v20, 0.0 }
 0x2c2   :  { %187 = vadd.xlane.f32.xlu1 %v186_v21 }
 0x335   :  { %v188_v22 = vpop.xlane.xlu1 %187 }
 0x336   :  { %v189_v23 = vmul.f32 %v188_v22, %v182_v16 }
 0x338   :  { %v190_v24 = vadd.f32 1e-05, %v189_v23 }
 0x33a   :  { %276 = vrsqrt.f32 %v190_v24  ;;  %vm197_vm15 = vweird.f32 %v190_v24 }
 0x340   :  { %v277_v25 = vpop.eup %276 }
 0x341   :  { %v192_v26 = vmul.f32 %v277_v25, %v190_v24  ;;  %vm198_vm14 = vweird.f32 %v277_v25 }
 0x342   :  { %vm199_vm0 = vmor %vm197_vm15, %vm198_vm14 }
 0x343   :  { %v193_v27 = vmul.f32 %v277_v25, %v192_v26 }
 0x345   :  { %v194_v28 = vmul.f32 0.5, %v193_v27 }
 0x347   :  { %v195_v29 = vsub.f32 1.5, %v194_v28 }
 0x349   :  { %v196_v30 = vmul.f32 %v277_v25, %v195_v29 }
 0x34b   :  { %v200_v32 = vsel %vm199_vm0, %v277_v25, %v196_v30 }
 0x34c   :  { %v201_v33 = vmul.f32 %v200_v32, %v184_v19 }
 0x34e   :  { %v205_v35 = vmul.f32 %v264_v31, %v201_v33 }
 0x350   :  { %v209_v36 = vadd.f32 %v265_v34, %v205_v35 }
 0x352   :  { %v210_v37 = vmul.f32 %v209_v36, %v209_v36 }
 0x354   :  { %v211_v38 = vsel %vm172_vm12, %v210_v37, 0.0 }
 0x355   :  { %212 = vadd.xlane.f32.xlu2 %v211_v38 }
 0x3c8   :  { %v213_v39 = vpop.xlane.xlu2 %212 }
 0x3c9   :  { %278 = vrsqrt.f32 %v213_v39  ;;  %vm220_vm2 = vweird.f32 %v213_v39 }
 0x3cf   :  { %v279_v40 = vpop.eup %278 }
 0x3d0   :  { %v215_v41 = vmul.f32 %v279_v40, %v213_v39  ;;  %vm221_vm1 = vweird.f32 %v279_v40 }
 0x3d1   :  { %vm222_vm3 = vmor %vm220_vm2, %vm221_vm1 }
 0x3d2   :  { %v216_v42 = vmul.f32 %v279_v40, %v215_v41 }
 0x3d4   :  { %v217_v43 = vmul.f32 0.5, %v216_v42 }
 0x3d6   :  { %v218_v44 = vsub.f32 1.5, %v217_v43 }
 0x3d8   :  { %v219_v45 = vmul.f32 %v279_v40, %v218_v44 }
 0x3da   :  { %v223_v46 = vsel %vm222_vm3, %v279_v40, %v219_v45 }
 0x3db   :  { %v224_v47 = vmul.f32 %v223_v46, %v209_v36 }
 0x3dd   :  { %225 = vst.msk [vmem:[#allocation2] sm:$0x3] %vm172_vm12, %v224_v47 }
 0x3de   :  { %236 = dma.vmem_to_hbm [thread:$0]  %s232_s12, 32, %s234_s14, [#allocation3]  }
 0x3df   :  { %304 = dma.done.wait [#allocation3], 32  }
 0x3e0   :  { %305 = vsyncadd [#allocation3], 4294967264 }
 0x3e1   :  { %241 = vsyncpa [#allocation3], 1 }

// kernel: text_encoder_gpt2_forward.3
= control target key start
LH: loop header
LB: loop body
LE: loop exit
PB: predicated region body
PF: predicated region fallthrough
CT: control target
= control target key end

     0   :  { %s1170_s29 = smov 0   ;;  %s1309_s0 = inlined_call_operand.vmem [shape: f32[2,8,32], index: 0, kind: input, shape index: {}]   ;;  %s1310_s1 = inlined_call_operand.vmem [shape: f32[2,1,8], index: 1, kind: input, shape index: {}]   ;;  %s1311_s2 = inlined_call_operand.vmem [shape: f32[1,32], index: 2, kind: input, shape index: {}]   ;;  %s1312_s3 = inlined_call_operand.vmem [shape: f32[1,32], index: 3, kind: input, shape index: {}]   ;;  %s1313_s4 = inlined_call_operand.vmem [shape: bf16[32,96], index: 4, kind: input, shape index: {}]   ;;  %s1314_s5 = inlined_call_operand.vmem [shape: f32[1,96], index: 5, kind: input, shape index: {}]   ;;  %s1315_s6 = inlined_call_operand.vmem [shape: bf16[32,32], index: 6, kind: input, shape index: {}]   ;;  %s1316_s7 = inlined_call_operand.vmem [shape: f32[1,32], index: 7, kind: input, shape index: {}]   ;;  %s1317_s8 = inlined_call_operand.vmem [shape: f32[1,32], index: 8, kind: input, shape index: {}]   ;;  %s1318_s9 = inlined_call_operand.vmem [shape: f32[1,32], index: 9, kind: input, shape index: {}]   ;;  %s1319_s10 = inlined_call_operand.vmem [shape: bf16[32,128], index: 10, kind: input, shape index: {}]   ;;  %s1320_s11 = inlined_call_operand.vmem [shape: f32[1,128], index: 11, kind: input, shape index: {}]   ;;  %s1321_s12 = inlined_call_operand.vmem [shape: bf16[128,32], index: 12, kind: input, shape index: {}]   ;;  %s1322_s13 = inlined_call_operand.vmem [shape: f32[1,32], index: 13, kind: input, shape index: {}]   ;;  %s1323_s14 = inlined_call_operand.vmem [shape: f32[2,8,32], index: 14, kind: output, shape index: {}]  }
   0x1 LB: > { %s953_s30 = sadd.s32 4294967295, %s1085_s29   ;;  %p957_p0 = scmp.ge.s32.totalorder %s1085_s29, 1  ;;  %s1085_s29 = sphi %s1170_s29, %s24_s29  }
   0x2   : > { %p419_p1 = scmp.lt.s32.totalorder %s1085_s29, 3 }
   0x4   : > { %p420_p2 = pnand %p957_p0, %p419_p1 }
   0x5   : > { %p466_p3 = scmp.lt.s32.totalorder (!%p420_p2), %s953_s30, 1  ;;  %s1088_s16 = smov (!%p420_p2), 80  }
   0x6   : > { %423 = sbr.rel (%p420_p2) target bundleno = 2272 (0x8e0), region = 76  ;;  %s1089_s17 = smov (!%p420_p2), 64  }
   0x7   : > { %s1092_s22 = smov (!%p420_p2), 48   ;;  %s1093_s23 = smov (!%p420_p2), 112  }
   0x8   : > { %s1094_s28 = smov (!%p420_p2), 16  }
   0xb   : > { %s1327_s30 = smov (!%p466_p3, %s953_s30), 1  ;;  %vm481_vm0 = vcmask 261120   ;;  %v1087_v2 = vmov 32.0   ;;  %v1026_v14 = vld [vmem:[%s1313_s4 + $0x8] sm:$0xff]  ;;  %v1025_v15 = vld [vmem:[%s1313_s4] sm:$0xff]  ;;  %vm611_vm5 = vcmask 1043456   ;;  %v556_v44 = vlaneseq }
   0xc   : > { %s958_s15 = sshll.u32 %s1327_s30, 3  ;;  %1063 = vrcp.f32 %v1087_v2  ;;  %549 = vmatpush.bf16.msra.mxu0 %v1026_v14  ;;  %v1055_v25 = vld [vmem:[%s1311_s2] ss:$0 sm:$0xff]  ;;  %vm571_vm6 = vcmask 130048   ;;  %s472_s21 = scalar_lea.vmem %s1310_s1, %s1327_s30  ;;  %v1091_v45 = vmov 0   ;;  %vm593_vm11 = vcmask 64512  }
   0xd   : > { %s469_s18 = scalar_lea.vmem %s1309_s0, %s958_s15  ;;  %v1056_v28 = vld [vmem:[%s1312_s3] ss:$0 sm:$0xff]  ;;  %v557_v47 = vshrl.u32 %v556_v44, 7  ;;  %v559_v48 = vand.u32 127, %v556_v44  ;;  %v1037_v44 = vld [vmem:[%s1321_s12 + $0x30] sm:$0xff] }
   0xe   : > { %v1186_v0 = vld [vmem:[%s469_s18] sm:$0xff]  ;;  %s1090_s18 = smov 96  }
   0xf   : > { %v482_v1 = vsel %vm481_vm0, %v1186_v0, 0.0  ;;  %v1057_v32 = vld [vmem:[%s1314_s5] ss:$0 sm:$0xff]  ;;  %vm560_vm8 = vcmp.le.s32.totalorder %v559_v48, %v557_v47 }
  0x10   : > { %483 = vadd.xlane.f32.xlu0 %v482_v1  ;;  %550 = vmatpush.bf16.msra.mxu0 %v1025_v15  ;;  %v561_v43 = vld [vmem:[%s472_s21] sm:$0x1] }
  0x11   : > { %vm562_vm7 = vcmp.gt.f32.partialorder %v561_v43, 0.5 }
  0x12   : > { %v1064_v3 = vpop.eup %1063  ;;  %v563_v46 = vsel %vm562_vm7, 1, %v1091_v45 }
  0x13   : > { %v486_v4 = vmul.f32 32.0, %v1064_v3  ;;  %vm490_vm1 = vweird.f32 %v1064_v3  ;;  %v564_v49 = vperm.slane %v563_v46, 0 }
  0x15   : > { %v487_v5 = vsub.f32 1.0, %v486_v4  ;;  %vm565_vm9 = vcmp.eq.s32.totalorder %v564_v49, 1 }
  0x16   : > { %vm1220_vm10 = vmand %vm560_vm8, %vm565_vm9 }
  0x17   : > { %v488_v6 = vmul.f32 %v1064_v3, %v487_v5 }
  0x19   : > { %v489_v7 = vadd.f32 %v1064_v3, %v488_v6 }
  0x1b   : > { %v1190_v8 = vsel %vm490_vm1, %v1064_v3, %v489_v7 }
  0x83   : > { %v484_v9 = vpop.xlane.xlu0 %483 }
  0x84   : > { %v492_v10 = vmul.f32 %v1190_v8, %v484_v9 }
  0x86   : > { %v493_v11 = vsub.f32 %v1186_v0, %v492_v10 }
  0x88   : > { %v494_v12 = vmul.f32 %v493_v11, %v493_v11 }
  0x8a   : > { %v495_v13 = vsel %vm481_vm0, %v494_v12, 0.0 }
  0x8b   : > { %496 = vadd.xlane.f32.xlu0 %v495_v13 }
  0xfe   : > { %v497_v16 = vpop.xlane.xlu0 %496 }
  0xff   : > { %v498_v17 = vmul.f32 %v497_v16, %v1190_v8 }
 0x101   : > { %v499_v18 = vadd.f32 1e-05, %v498_v17 }
 0x103   : > { %1065 = vrsqrt.f32 %v499_v18  ;;  %vm506_vm3 = vweird.f32 %v499_v18 }
 0x109   : > { %v1066_v19 = vpop.eup %1065 }
 0x10a   : > { %v501_v20 = vmul.f32 %v1066_v19, %v499_v18  ;;  %vm507_vm2 = vweird.f32 %v1066_v19 }
 0x10b   : > { %vm508_vm4 = vmor %vm506_vm3, %vm507_vm2 }
 0x10c   : > { %v502_v21 = vmul.f32 %v1066_v19, %v501_v20 }
 0x10e   : > { %v503_v22 = vmul.f32 0.5, %v502_v21 }
 0x110   : > { %v504_v23 = vsub.f32 1.5, %v503_v22  ;;  %v1028_v22 = vld [vmem:[%s1315_s6 + $0x8] sm:$0xff] }
 0x111   : > { %721 = vmatpush.bf16.msrb.mxu0 %v1028_v22 }
 0x112   : > { %v505_v24 = vmul.f32 %v1066_v19, %v504_v23  ;;  %v1027_v23 = vld [vmem:[%s1315_s6] sm:$0xff] }
 0x114   : > { %v509_v26 = vsel %vm508_vm4, %v1066_v19, %v505_v24 }
 0x115   : > { %v510_v27 = vmul.f32 %v509_v26, %v493_v11  ;;  %722 = vmatpush.bf16.msrb.mxu0 %v1027_v23 }
 0x117   : > { %v514_v29 = vmul.f32 %v1055_v25, %v510_v27 }
 0x119   : > { %v518_v30 = vadd.f32 %v1056_v28, %v514_v29  ;;  %v1058_v29 = vld [vmem:[%s1316_s7] ss:$0 sm:$0xff] }
 0x11b   : > { %v519_v31 = vpack.c.bf16 %v518_v30, %v518_v30 }
 0x11d   : > { %968 = vmatmul.msk.bf16.vlgmr.msra.gmra.mxu0 %vm481_vm0, %v519_v31 }
 0x19a   : > { %v552_v33 = vpop.f32.mrf.mxu0 }
 0x19b   : > { %v553_v34 = vadd.f32 %v1057_v32, %v552_v33 }
 0x19d   : > { %v567_v35 = vpack.c.bf16 %v553_v34, %v553_v34 }
 0x19f   : > { %630 = vrot.lane.b32.xlu0 %v567_v35, %s1088_s16  ;;  %606 = vrot.lane.b32.xlu2 %v567_v35, %s1089_s17 }
 0x1a0   : > { %569 = vrot.lane.b32.xlu1 %v567_v35, %s1090_s18 }
 0x1a2   : > { %v554_v36 = vpop.f32.mrf.mxu0 }
 0x1f9   : > { %v607_v37 = vpop.permute.xlu2 %606 }
 0x1fa   : > { %v613_v38 = vsel %vm611_vm5, %v607_v37, 0 }
 0x1fb   : > { %622 = vmatpush.bf16.msra.mxu2 %v613_v38 }
 0x211   : > { %v631_v39 = vpop.permute.xlu0 %630 }
 0x212   : > { %v570_v40 = vpop.permute.xlu1 %569  ;;  %v636_v41 = vsel %vm571_vm6, %v631_v39, 0 }
 0x213   : > { %v576_v42 = vsel %vm571_vm6, %v570_v40, 0  ;;  %645 = vmatpush.bf16.xpose.msrb.mxu2 %v636_v41  ;;  %v1030_v40 = vld [vmem:[%s1319_s10 + $0x8] sm:$0xff]  ;;  %v1038_v41 = vld [vmem:[%s1321_s12 + $0x38] sm:$0xff] }
 0x214   : > { %585 = vmatpush.bf16.xpose.msra.mxu1 %v576_v42  ;;  %876 = vmatpush.bf16.msra.mxu3 %v1038_v41 }
 0x218   : > { %877 = vmatpush.bf16.msra.mxu3 %v1037_v44 }
 0x21b   : > { %969 = vmatmul.msk.bf16.vlgmr.msra.gmra.mxu1 %vm571_vm6, %v567_v35 }
 0x21c   : > { %791 = vmatpush.bf16.msrb.mxu1 %v1030_v40 }
 0x298   : > { %v587_v50 = vpop.f32.mrf.mxu1 }
 0x299   : > { %v591_v52 = vmul.f32 0.25, %v587_v50 }
 0x29b   : > { %v592_v53 = vsel %vm1220_vm10, %v591_v52, -3.4028235e+38 }
 0x29c   : > { %v594_v54 = vsel %vm593_vm11, %v592_v53, -inf }
 0x29d   : > { %595 = vmax.xlane.f32.xlu1 %v594_v54  ;;  %v1060_v54 = vld [vmem:[%s1318_s9] ss:$0 sm:$0xff] }
 0x2a0   : > { %v589_v55 = vpop.f32.mrf.mxu1 }
 0x2b6   : > { %665 = vrot.lane.b32.xlu1 %v567_v35, %s1092_s22  ;;  %s476_s22 = scalar_lea.vmem %s1323_s14, %s958_s15 }
 0x310   : > { %v596_v56 = vpop.xlane.xlu1 %595 }
 0x311   : > { %v597_v57 = vsub.f32 %v592_v53, %v596_v56 }
 0x313   : > { %v598_v58 = vmul.f32 1.442695, %v597_v57 }
 0x315   : > { %1067 = vpow2.f32 %v598_v58  ;;  %v1036_v58 = vld [vmem:[%s1321_s12 + $0x28] sm:$0xff] }
 0x316   : > { %878 = vmatpush.bf16.msra.mxu3 %v1036_v58 }
 0x31b   : > { %v1068_v59 = vpop.eup %1067 }
 0x31c   : > { %v600_v60 = vsel %vm593_vm11, %v1068_v59, 0.0 }
 0x31d   : > { %601 = vadd.xlane.f32.xlu2 %v600_v60  ;;  %v1034_v60 = vld [vmem:[%s1321_s12 + $0x18] sm:$0xff] }
 0x328   : > { %v666_v1 = vpop.permute.xlu1 %665 }
 0x329   : > { %v671_v3 = vsel %vm611_vm5, %v666_v1, 0  ;;  %v1061_v1 = vld [vmem:[%s1320_s11] ss:$0 sm:$0xff] }
 0x335   : > { %628 = vrot.lane.b32.xlu2 %v567_v35, %s1093_s23 }
 0x390   : > { %v602_v61 = vpop.xlane.xlu2 %601 }
 0x391   : > { %1069 = vrcp.f32 %v602_v61  ;;  %v1033_v61 = vld [vmem:[%s1321_s12 + $0x10] sm:$0xff] }
 0x397   : > { %v1070_v62 = vpop.eup %1069 }
 0x398   : > { %v604_v63 = vmul.f32 %v1070_v62, %v1068_v59  ;;  %v629_v4 = vpop.permute.xlu2 %628  ;;  %v1035_v59 = vld [vmem:[%s1321_s12 + $0x20] sm:$0xff]  ;;  %v1032_v62 = vld [vmem:[%s1321_s12 + $0x8] sm:$0xff] }
 0x399   : > { %879 = vmatpush.bf16.msra.mxu3 %v1035_v59 }
 0x39a   : > { %v605_v2 = vpack.c.bf16 %v604_v63, %v604_v63  ;;  %v1031_v63 = vld [vmem:[%s1321_s12] sm:$0xff] }
 0x39c   : > { %970 = vmatmul.msk.bf16.vlgmr.msra.gmra.mxu2 %vm593_vm11, %v605_v2 }
 0x39d   : > { %680 = vmatpush.bf16.msra.mxu2 %v671_v3  ;;  %880 = vmatpush.bf16.msra.mxu3 %v1034_v60 }
 0x3a1   : > { %881 = vmatpush.bf16.msra.mxu3 %v1033_v61 }
 0x3a5   : > { %882 = vmatpush.bf16.msra.mxu3 %v1032_v62 }
 0x3a9   : > { %883 = vmatpush.bf16.msra.mxu3 %v1031_v63 }
 0x3ac   : > { %971 = vmatmul.msk.bf16.vlgmr.msrb.gmra.mxu2 %vm571_vm6, %v629_v4 }
 0x41f   : > { %v624_v5 = vpop.f32.mrf.mxu2 }
 0x427   : > { %v626_v6 = vpop.f32.mrf.mxu2 }
 0x42f   : > { %v647_v7 = vpop.f32.mrf.mxu2 }
 0x430   : > { %v651_v9 = vmul.f32 0.25, %v647_v7 }
 0x432   : > { %v652_v10 = vsel %vm1220_vm10, %v651_v9, -3.4028235e+38 }
 0x433   : > { %v653_v11 = vsel %vm593_vm11, %v652_v10, -inf }
 0x434   : > { %654 = vmax.xlane.f32.xlu0 %v653_v11 }
 0x437   : > { %v649_v12 = vpop.f32.mrf.mxu2 }
 0x4a7   : > { %v655_v13 = vpop.xlane.xlu0 %654 }
 0x4a8   : > { %v656_v14 = vsub.f32 %v652_v10, %v655_v13 }
 0x4aa   : > { %v657_v15 = vmul.f32 1.442695, %v656_v14 }
 0x4ac   : > { %1071 = vpow2.f32 %v657_v15 }
 0x4b2   : > { %v1072_v16 = vpop.eup %1071 }
 0x4b3   : > { %v659_v17 = vsel %vm593_vm11, %v1072_v16, 0.0 }
 0x4b4   : > { %660 = vadd.xlane.f32.xlu2 %v659_v17 }
 0x527   : > { %v661_v18 = vpop.xlane.xlu2 %660 }
 0x528   : > { %1073 = vrcp.f32 %v661_v18 }
 0x52e   : > { %v1074_v19 = vpop.eup %1073 }
 0x52f   : > { %v663_v20 = vmul.f32 %v1074_v19, %v1072_v16  ;;  %v1062_v16 = vld [vmem:[%s1322_s13] ss:$0 sm:$0xff] }
 0x531   : > { %v664_v21 = vpack.c.bf16 %v663_v20, %v663_v20 }
 0x533   : > { %972 = vmatmul.msk.bf16.vlgmr.msra.gmra.mxu2 %vm593_vm11, %v664_v21 }
 0x5b6   : > { %v682_v24 = vpop.f32.mrf.mxu2 }
 0x5b7   : > { %687 = vrot.lane.b32.xlu1 %v682_v24, %s1094_s28 }
 0x5be   : > { %v684_v25 = vpop.f32.mrf.mxu2 }
 0x629   : > { %v688_v26 = vpop.permute.xlu1 %687 }
 0x62a   : > { %v690_v27 = vsel %vm571_vm6, %v624_v5, %v688_v26 }
 0x62b   : > { %v691_v28 = vpack.c.bf16 %v690_v27, %v690_v27 }
 0x62d   : > { %981 = vmatmul.msk.bf16.vlgmr.msrb.gmra.mxu0 %vm481_vm0, %v691_v28 }
 0x6aa   : > { %v724_v30 = vpop.f32.mrf.mxu0 }
 0x6ab   : > { %v725_v31 = vadd.f32 %v1058_v29, %v724_v30 }
 0x6ad   : > { %v1248_v32 = vadd.f32 %v725_v31, %v1186_v0  ;;  %v1029_v0 = vld [vmem:[%s1319_s10] sm:$0xff] }
 0x6ae   : > { %792 = vmatpush.bf16.msrb.mxu1 %v1029_v0 }
 0x6af   : > { %v731_v33 = vsel %vm481_vm0, %v1248_v32, 0.0 }
 0x6b0   : > { %732 = vadd.xlane.f32.xlu0 %v731_v33 }
 0x6b2   : > { %v726_v34 = vpop.f32.mrf.mxu0 }
 0x723   : > { %v733_v35 = vpop.xlane.xlu0 %732 }
 0x724   : > { %v734_v36 = vmul.f32 %v733_v35, %v1190_v8 }
 0x726   : > { %v735_v37 = vsub.f32 %v1248_v32, %v734_v36 }
 0x728   : > { %v736_v38 = vmul.f32 %v735_v37, %v735_v37 }
 0x72a   : > { %v737_v39 = vsel %vm481_vm0, %v736_v38, 0.0 }
 0x72b   : > { %738 = vadd.xlane.f32.xlu2 %v737_v39 }
 0x79e   : > { %v739_v42 = vpop.xlane.xlu2 %738 }
 0x79f   : > { %v740_v43 = vmul.f32 %v739_v42, %v1190_v8  ;;  %v1059_v8 = vld [vmem:[%s1317_s8] ss:$0 sm:$0xff] }
 0x7a1   : > { %v741_v45 = vadd.f32 1e-05, %v740_v43 }
 0x7a3   : > { %1075 = vrsqrt.f32 %v741_v45  ;;  %vm748_vm13 = vweird.f32 %v741_v45 }
 0x7a9   : > { %v1076_v46 = vpop.eup %1075 }
 0x7aa   : > { %v743_v47 = vmul.f32 %v1076_v46, %v741_v45  ;;  %vm749_vm12 = vweird.f32 %v1076_v46 }
 0x7ab   : > { %vm750_vm14 = vmor %vm748_vm13, %vm749_vm12 }
 0x7ac   : > { %v744_v48 = vmul.f32 %v1076_v46, %v743_v47 }
 0x7ae   : > { %v745_v49 = vmul.f32 0.5, %v744_v48 }
 0x7b0   : > { %v746_v50 = vsub.f32 1.5, %v745_v49 }
 0x7b2   : > { %v747_v51 = vmul.f32 %v1076_v46, %v746_v50 }
 0x7b4   : > { %v751_v52 = vsel %vm750_vm14, %v1076_v46, %v747_v51 }
 0x7b5   : > { %v752_v53 = vmul.f32 %v751_v52, %v735_v37 }
 0x7b7   : > { %v756_v55 = vmul.f32 %v1059_v8, %v752_v53 }
 0x7b9   : > { %v760_v56 = vadd.f32 %v1060_v54, %v756_v55 }
 0x7bb   : > { %v761_v57 = vpack.c.bf16 %v760_v56, %v760_v56 }
 0x7bd   : > { %990 = vmatmul.msk.bf16.vlgmr.msrb.gmra.mxu1 %vm481_vm0, %v761_v57 }
 0x83a   : > { %v794_v2 = vpop.f32.mrf.mxu1 }
 0x83b   : > { %v795_v3 = vadd.f32 %v1061_v1, %v794_v2 }
 0x83d   : > { %v799_v4 = vmul.f32 0.044715, %v795_v3  ;;  %v798_v12 = vmul.f32 0.5, %v795_v3 }
 0x83f   : > { %v800_v5 = vmul.f32 %v799_v4, %v795_v3 }
 0x841   : > { %v801_v6 = vmul.f32 %v800_v5, %v795_v3 }
 0x842   : > { %v796_v7 = vpop.f32.mrf.mxu1 }
 0x843   : > { %v802_v9 = vadd.f32 %v801_v6, %v795_v3 }
 0x845   : > { %v803_v10 = vmul.f32 0.7978846, %v802_v9 }
 0x847   : > { %1077 = vtanh.f32 %v803_v10 }
 0x84d   : > { %v1078_v11 = vpop.eup %1077 }
 0x84e   : > { %v805_v13 = vadd.f32 1.0, %v1078_v11 }
 0x850   : > { %v806_v14 = vmul.f32 %v805_v13, %v798_v12 }
 0x852   : > { %v807_v15 = vpack.c.bf16 %v806_v14, %v806_v14 }
 0x854   : > { %884 = vmatmul.bf16.vlgmr.msra.gmra.mxu3 %v807_v15 }
 0x8d7   : > { %v885_v17 = vpop.f32.mrf.mxu3 }
 0x8d8   : > { %v886_v18 = vadd.f32 %v1062_v16, %v885_v17 }
 0x8da   : > { %v889_v19 = vadd.f32 %v886_v18, %v1248_v32 }
 0x8dc   : > { %890 = vst.msk [vmem:[%s476_s22] sm:$0xff] %vm481_vm0, %v889_v19 }
 0x8df   : > { %v887_v20 = vpop.f32.mrf.mxu3 }
 0x8e0 PF: > { %s24_s29 = sadd.s32 1, %s1085_s29  }
 0x8e1   : > { %p21_p4 = scmp.ge.s32.totalorder %s24_s29, 4  }
 0x8e3   :  { %23 = sbr.rel (!%p21_p4) target bundleno = 1 (0x1), region = 109 }

</bundles_post_ra>
